<compile_context>
chip_gen: v7x
topology: tpu7x:2x2x1
jax: 0.10.0
libtpu: 0.0.40
codegen_flags: <defaults>
</compile_context>

<pallas_src>
import functools

import jax
import jax.numpy as jnp
from jax import lax
from jax.experimental import pallas as pl
from jax.experimental.pallas import tpu as pltpu


def _round_up(x: int, m: int) -> int:
    return (x + m - 1) // m * m


def _cdiv(a: int, b: int) -> int:
    return (a + b - 1) // b


def mlp_kernel(x_ref, w1_ref, b1_ref, w2_ref, b2_ref, o_ref):
    # x_ref  : (TB, 10)  native-layout input tile, f32 (cast to bf16 here)
    # w1_ref : (50, 10)  fc1 weight, bf16, VMEM-resident
    # b1_ref : (50, 1)   fc1 bias, f32 (broadcast across lanes)
    # w2_ref : (50, 1)   fc2 weight column, f32 (broadcast across lanes)
    # b2_ref : (1,)      fc2 bias scalar in SMEM
    # o_ref  : (1, TB)   output tile, batch on lanes (lane-dense stores)
    x_bf = x_ref[...].astype(jnp.bfloat16)
    # fc1 on the MXU: contract the last axis of BOTH operands (q @ k^T form),
    # producing h feature-major (50, TB) with batch on the lane axis -- no
    # data transpose of x anywhere.
    h = lax.dot_general(
        w1_ref[...], x_bf,
        dimension_numbers=(((1,), (1,)), ((), ())),
        preferred_element_type=jnp.float32)                    # (50, TB) f32
    h = jnp.maximum(h + b1_ref[...], 0.0)                       # VPU bias + ReLU
    # fc2 has a single output feature -> VPU multiply + sublane reduction
    # (mostly vreg-wise VALU adds + one final XLU sublane reduce) instead of
    # an N=1 MXU matmul.
    y = jnp.sum(h * w2_ref[...], axis=0, keepdims=True) + b2_ref[0]  # (1, TB)
    # Exact sigmoid via a single EUP tanh.
    o_ref[...] = 0.5 * (jnp.tanh(0.5 * y) + 1.0)


@functools.partial(jax.jit, static_argnames=("block_batch",))
def simple_nn_forward(x, w1, b1, w2, b2, *, block_batch=8192):
    """sigmoid(relu(x @ w1.T + b1) @ w2.T + b2), PyTorch nn.Linear layouts.

    x: (B, 10), w1: (50, 10), b1: (50,), w2: (1, 50), b2: (1,). Returns (B, 1) f32.
    """
    B, in_f = x.shape
    hid = w1.shape[0]  # 50

    # Pad the batch only to the 128-lane granule; the grid handles a partial
    # last tile (OOB reads are garbage in discarded columns, OOB writes drop).
    b_aligned = _round_up(B, 128)
    tb = min(_round_up(block_batch, 128), b_aligned)
    # v7x megacore: guarantee >= 2 grid steps when there is enough work so the
    # "parallel" batch axis actually lands on both TensorCores.
    if _cdiv(b_aligned, tb) < 2 and b_aligned >= 256:
        tb = _round_up(_cdiv(b_aligned, 2), 128)
    grid_b = _cdiv(b_aligned, tb)

    x = x.astype(jnp.float32)
    if b_aligned != B:
        x = jnp.pad(x, ((0, b_aligned - B), (0, 0)))

    w1_bf = w1.astype(jnp.bfloat16)                       # (50, 10), resident
    b1_c = b1.reshape(hid, 1).astype(jnp.float32)         # (50, 1)
    w2_c = w2.reshape(hid, 1).astype(jnp.float32)         # (50, 1) == w2.T
    b2_s = b2.reshape(1).astype(jnp.float32)              # (1,) SMEM scalar

    out_pad = pl.pallas_call(
        mlp_kernel,
        out_shape=jax.ShapeDtypeStruct((1, b_aligned), jnp.float32),
        grid=(grid_b,),
        in_specs=[
            pl.BlockSpec((tb, in_f), lambda i: (i, 0)),          # x tile (native)
            pl.BlockSpec((hid, in_f), lambda i: (0, 0)),         # w1 (resident)
            pl.BlockSpec((hid, 1), lambda i: (0, 0)),            # b1 (resident)
            pl.BlockSpec((hid, 1), lambda i: (0, 0)),            # w2 col (resident)
            pl.BlockSpec(memory_space=pltpu.MemorySpace.SMEM),   # b2 scalar
        ],
        out_specs=pl.BlockSpec((1, tb), lambda i: (0, i)),
        compiler_params=pltpu.CompilerParams(
            dimension_semantics=("parallel",),       # batch tiles across 2 TCs
            vmem_limit_bytes=48 * 1024 * 1024,       # fits v7x 64 MiB physical
        ),
    )(x, w1_bf, b1_c, w2_c, b2_s)

    return out_pad[:, :B].T  # (B, 1)


def init_params(key):
    # PyTorch nn.Linear default init: U(-1/sqrt(fan_in), 1/sqrt(fan_in)),
    # stored in PyTorch layout (out_features, in_features).
    k1, k2, k3, k4 = jax.random.split(key, 4)
    bound1 = 1.0 / jnp.sqrt(10.0)
    bound2 = 1.0 / jnp.sqrt(50.0)
    w1 = jax.random.uniform(k1, (50, 10), jnp.float32, -bound1, bound1)
    b1 = jax.random.uniform(k2, (50,), jnp.float32, -bound1, bound1)
    w2 = jax.random.uniform(k3, (1, 50), jnp.float32, -bound2, bound2)
    b2 = jax.random.uniform(k4, (1,), jnp.float32, -bound2, bound2)
    return w1, b1, w2, b2


if __name__ == "__main__":
    key = jax.random.PRNGKey(0)
    key_x, key_p = jax.random.split(key)
    B = 8
    x = jax.random.normal(key_x, (B, 10), jnp.float32)
    w1, b1, w2, b2 = init_params(key_p)

    out = simple_nn_forward(x, w1, b1, w2, b2)
    jax.block_until_ready(out)

    # Reference forward in plain JAX f32 (PyTorch semantics: y = x @ W^T + b).
    ref = 1.0 / (1.0 + jnp.exp(-(jnp.maximum(x @ w1.T + b1, 0.0) @ w2.T + b2)))
    assert out.shape == (B, 1)
    # Sigmoid is exact now (tanh form); remaining error is the bf16 fc1
    # matmul (10-term contraction, f32 accumulate) -> well under 2e-3.
    assert jnp.allclose(out, ref, atol=2e-3, rtol=2e-3)

    print("KERNEL_OK")
</pallas_src>

<mosaic_0001>
module attributes {stable_mosaic.version = 11 : i64} {
  func.func @mlp_kernel(%arg0: i32, %arg1: memref<128x10xf32, #tpu.memory_space<vmem>>, %arg2: memref<50x10xbf16, #tpu.memory_space<vmem>>, %arg3: memref<50x1xf32, #tpu.memory_space<vmem>>, %arg4: memref<50x1xf32, #tpu.memory_space<vmem>>, %arg5: memref<1xf32, #tpu.memory_space<smem>>, %arg6: memref<1x128xf32, #tpu.memory_space<vmem>>) attributes {dimension_semantics = [#tpu.dimension_semantics<parallel>], iteration_bounds = array<i64: 1>, scalar_prefetch = 0 : i64, scratch_operands = 0 : i64, tpu.core_type = #tpu.core_type<tc>, window_params = [{transform_indices = @transform_0, window_bounds = array<i64: 128, 10>}, {pipeline_mode = #tpu.pipeline_mode<synchronous>, transform_indices = @transform_1, window_bounds = array<i64: 50, 10>}, {pipeline_mode = #tpu.pipeline_mode<synchronous>, transform_indices = @transform_2, window_bounds = array<i64: 50, 1>}, {pipeline_mode = #tpu.pipeline_mode<synchronous>, transform_indices = @transform_3, window_bounds = array<i64: 50, 1>}, {transform_indices = @transform_4, window_bounds = array<i64: 1>}, {transform_indices = @transform_5, window_bounds = array<i64: 1, 128>}]} {
    %c0 = arith.constant 0 : index
    %c0_0 = arith.constant 0 : index
    %0 = vector.load %arg1[%c0, %c0_0] : memref<128x10xf32, #tpu.memory_space<vmem>>, vector<128x10xf32>
    %1 = arith.truncf %0 : vector<128x10xf32> to vector<128x10xbf16>
    %c0_1 = arith.constant 0 : index
    %c0_2 = arith.constant 0 : index
    %2 = vector.load %arg2[%c0_1, %c0_2] : memref<50x10xbf16, #tpu.memory_space<vmem>>, vector<50x10xbf16>
    %cst = arith.constant dense<0.000000e+00> : vector<50x128xf32>
    %3 = tpu.matmul %2, %1, %cst {dimension_numbers = #tpu.dot_dimension_numbers<[1], [1], [0], [0], [0, 0, 1, 0], [], []>} : vector<50x10xbf16>, vector<128x10xbf16>, vector<50x128xf32> -> vector<50x128xf32>
    %c0_3 = arith.constant 0 : index
    %c0_4 = arith.constant 0 : index
    %4 = vector.load %arg3[%c0_3, %c0_4] : memref<50x1xf32, #tpu.memory_space<vmem>>, vector<50x1xf32>
    %5 = vector.broadcast %4 : vector<50x1xf32> to vector<50x128xf32>
    %6 = arith.addf %3, %5 : vector<50x128xf32>
    %cst_5 = arith.constant 0.000000e+00 : f32
    %7 = vector.broadcast %cst_5 : f32 to vector<50x128xf32>
    %8 = arith.maximumf %6, %7 : vector<50x128xf32>
    %c0_6 = arith.constant 0 : index
    %c0_7 = arith.constant 0 : index
    %9 = vector.load %arg4[%c0_6, %c0_7] : memref<50x1xf32, #tpu.memory_space<vmem>>, vector<50x1xf32>
    %10 = vector.broadcast %9 : vector<50x1xf32> to vector<50x128xf32>
    %11 = arith.mulf %8, %10 : vector<50x128xf32>
    %cst_8 = arith.constant dense<0.000000e+00> : vector<128xf32>
    %12 = vector.multi_reduction <add>, %11, %cst_8 [0] : vector<50x128xf32> to vector<128xf32>
    %13 = vector.shape_cast %12 : vector<128xf32> to vector<1x128xf32>
    %c0_9 = arith.constant 0 : index
    %14 = memref.load %arg5[%c0_9] : memref<1xf32, #tpu.memory_space<smem>>
    %15 = vector.broadcast %14 : f32 to vector<1x128xf32>
    %16 = arith.addf %13, %15 : vector<1x128xf32>
    %cst_10 = arith.constant 5.000000e-01 : f32
    %17 = vector.broadcast %cst_10 : f32 to vector<1x128xf32>
    %18 = arith.mulf %17, %16 : vector<1x128xf32>
    %19 = math.tanh %18 : vector<1x128xf32>
    %cst_11 = arith.constant 1.000000e+00 : f32
    %20 = vector.broadcast %cst_11 : f32 to vector<1x128xf32>
    %21 = arith.addf %19, %20 : vector<1x128xf32>
    %cst_12 = arith.constant 5.000000e-01 : f32
    %22 = vector.broadcast %cst_12 : f32 to vector<1x128xf32>
    %23 = arith.mulf %22, %21 : vector<1x128xf32>
    %c0_13 = arith.constant 0 : index
    %c0_14 = arith.constant 0 : index
    %24 = vector.load %arg6[%c0_13, %c0_14] : memref<1x128xf32, #tpu.memory_space<vmem>>, vector<1x128xf32>
    tpu.vector_store %arg6[%c0_13, %c0_14], %23 {strides = array<i32>} : memref<1x128xf32, #tpu.memory_space<vmem>>, vector<1x128xf32>,
    return
  }
  func.func @transform_0(%arg0: i32) -> (i32, i32) {
    %c0_i32 = arith.constant 0 : i32
    %c0_i32_0 = arith.constant 0 : i32
    return %arg0, %c0_i32 : i32, i32
  }
  func.func @transform_1(%arg0: i32) -> (i32, i32) {
    %c0_i32 = arith.constant 0 : i32
    %c0_i32_0 = arith.constant 0 : i32
    %c0_i32_1 = arith.constant 0 : i32
    return %c0_i32, %c0_i32_0 : i32, i32
  }
  func.func @transform_2(%arg0: i32) -> (i32, i32) {
    %c0_i32 = arith.constant 0 : i32
    %c0_i32_0 = arith.constant 0 : i32
    %c0_i32_1 = arith.constant 0 : i32
    return %c0_i32, %c0_i32_0 : i32, i32
  }
  func.func @transform_3(%arg0: i32) -> (i32, i32) {
    %c0_i32 = arith.constant 0 : i32
    %c0_i32_0 = arith.constant 0 : i32
    %c0_i32_1 = arith.constant 0 : i32
    return %c0_i32, %c0_i32_0 : i32, i32
  }
  func.func @transform_4(%arg0: i32) -> i32 {
    %c0_i32 = arith.constant 0 : i32
    %c0_i32_0 = arith.constant 0 : i32
    return %c0_i32 : i32
  }
  func.func @transform_5(%arg0: i32) -> (i32, i32) {
    %c0_i32 = arith.constant 0 : i32
    %c0_i32_0 = arith.constant 0 : i32
    return %c0_i32, %arg0 : i32, i32
  }
}

</mosaic_0001>

<bundles_post_ra>
// kernel: simple_nn_forward.1
= control target key start
LH: loop header
LB: loop body
LE: loop exit
PB: predicated region body
PF: predicated region fallthrough
CT: control target
= control target key end

     0   :  { %vm113_vm0 = vcmask 80896   ;;  %v381_v3 = vmov 0   ;;  %vm275_vm1 = vcmask 1041408   ;;  %s548_s0 = inlined_call_operand.vmem [shape: f32[128,10], index: 0, kind: input, shape index: {}]   ;;  %s549_s1 = inlined_call_operand.vmem [shape: bf16[50,10], index: 1, kind: input, shape index: {}]   ;;  %s550_s2 = inlined_call_operand.vmem [shape: f32[50,1], index: 2, kind: input, shape index: {}]   ;;  %s551_s3 = inlined_call_operand.vmem [shape: f32[50,1], index: 3, kind: input, shape index: {}]   ;;  %s552_s4 = inlined_call_operand.<no memory space> [shape: f32[1], index: 4, kind: input, shape index: {}]   ;;  %s553_s5 = inlined_call_operand.vmem [shape: f32[1,128], index: 5, kind: output, shape index: {}]  }
   0x1   :  { %v22_v0 = vld [vmem:[%s548_s0] sm:$0xff]  ;;  %v23_v1 = vld [vmem:[%s548_s0 + $0x8] sm:$0xff]  ;;  %v24_v2 = vld [vmem:[%s548_s0 + $0x10] sm:$0xff]  ;;  %373 = vset.pattern.permute.xlu0 %v381_v3  ;;  %374 = vset.pattern.permute.xlu1 %v381_v3 }
   0x2   :  { %v38_v4 = vpack.c.bf16 %v23_v1, %v22_v0  ;;  %v25_v5 = vld [vmem:[%s548_s0 + $0x18] sm:$0xff]  ;;  %v26_v8 = vld [vmem:[%s548_s0 + $0x20] sm:$0xff]  ;;  %v27_v9 = vld [vmem:[%s548_s0 + $0x28] sm:$0xff] }
   0x3   :  { %v39_v6 = vpack.c.bf16 %v25_v5, %v24_v2  ;;  %v375_v10 = vld [vmem:[%s549_s1] sm:$0xff]   ;;  %v376_v11 = vld [vmem:[%s549_s1 + $0x10] sm:$0xff]   ;;  %v40_v14 = vpack.c.bf16 %v27_v9, %v26_v8  ;;  %v54_v16 = vld [vmem:[%s550_s2 + $0x8] sm:$0xff] }
   0x4   :  { %356 = vmatprep.subr.msk.bf16.mxu0 %vm113_vm0, %v38_v4  ;;  %357 = vmatprep.subr.msk.bf16.mxu1 %vm113_vm0, %v38_v4  ;;  %v127_v7 = vsel %vm113_vm0, %v38_v4, 0  ;;  %v53_v12 = vld [vmem:[%s550_s2] sm:$0xff]  ;;  %v55_v15 = vld [vmem:[%s550_s2 + $0x10] sm:$0xff]  ;;  %v56_v17 = vld [vmem:[%s550_s2 + $0x18] sm:$0xff] }
   0x5   :  { %317 = vmatpush3.bf16.xpose.msra.mxu0 %v127_v7  ;;  %348 = vmatpush3.bf16.xpose.msra.mxu1 %v127_v7  ;;  %v130_v13 = vsel %vm113_vm0, %v39_v6, 0  ;;  %v28_v18 = vld [vmem:[%s548_s0 + $0x30] sm:$0xff]  ;;  %v29_v19 = vld [vmem:[%s548_s0 + $0x38] sm:$0xff]  ;;  %v221_v20 = vld [vmem:[%s551_s3] sm:$0xff]  ;;  %v133_v22 = vsel %vm113_vm0, %v40_v14, 0 }
   0x6   :  { %358 = vmatprep.subr.msk.bf16.mxu0 %vm113_vm0, %v39_v6  ;;  %359 = vmatprep.subr.msk.bf16.mxu1 %vm113_vm0, %v39_v6  ;;  %v222_v21 = vld [vmem:[%s551_s3 + $0x8] sm:$0xff]  ;;  %v41_v23 = vpack.c.bf16 %v29_v19, %v28_v18  ;;  %v57_v24 = vld [vmem:[%s550_s2 + $0x20] sm:$0xff]  ;;  %v223_v25 = vld [vmem:[%s551_s3 + $0x10] sm:$0xff] }
   0x7   :  { %332 = vmatprep.mubr.msk.bf16.mxu0 %vm113_vm0, %v375_v10  ;;  %336 = vmatprep.mubr.msk.bf16.mxu1 %vm113_vm0, %v376_v11  ;;  %v30_v26 = vld [vmem:[%s548_s0 + $0x40] sm:$0xff]  ;;  %v31_v27 = vld [vmem:[%s548_s0 + $0x48] sm:$0xff]  ;;  %v224_v29 = vld [vmem:[%s551_s3 + $0x18] sm:$0xff] }
   0x8   :  { %62 = vperm.xlu0 %373, %v53_v12   ;;  %72 = vperm.xlu1 %374, %v55_v15   ;;  %v58_v28 = vld [vmem:[%s550_s2 + $0x28] sm:$0xff]  ;;  %v136_v30 = vsel %vm113_vm0, %v41_v23, 0  ;;  %v42_v31 = vpack.c.bf16 %v31_v27, %v30_v26  ;;  %v59_v32 = vld [vmem:[%s550_s2 + $0x30] sm:$0x3]  ;;  %v225_v33 = vld [vmem:[%s551_s3 + $0x20] sm:$0xff] }
   0x9   :  { %v32_v34 = vld [vmem:[%s548_s0 + $0x50] sm:$0xff]  ;;  %v33_v35 = vld [vmem:[%s548_s0 + $0x58] sm:$0xff]  ;;  %v226_v36 = vld [vmem:[%s551_s3 + $0x28] sm:$0xff] }
   0xa   :  { %v227_v37 = vld [vmem:[%s551_s3 + $0x30] sm:$0x3]  ;;  %v139_v38 = vsel %vm113_vm0, %v42_v31, 0  ;;  %v43_v39 = vpack.c.bf16 %v33_v35, %v32_v34  ;;  %v34_v40 = vld [vmem:[%s548_s0 + $0x60] sm:$0xff]  ;;  %v35_v41 = vld [vmem:[%s548_s0 + $0x68] sm:$0xff] }
   0xb   :  { %v44_v43 = vpack.c.bf16 %v35_v41, %v34_v40  ;;  %v36_v44 = vld [vmem:[%s548_s0 + $0x70] sm:$0xff]  ;;  %v37_v45 = vld [vmem:[%s548_s0 + $0x78] sm:$0xff]  ;;  %v377_v49 = vld [vmem:[%s549_s1 + $0x8] sm:$0xff]  }
   0xc   :  { %67 = vperm.xlu0 %373, %v54_v16   ;;  %77 = vperm.xlu1 %374, %v56_v17   ;;  %v142_v42 = vsel %vm113_vm0, %v43_v39, 0  ;;  %v45_v47 = vpack.c.bf16 %v37_v45, %v36_v44  ;;  %v378_v50 = vld [vmem:[%s549_s1 + $0x18] ss:$0 sps:$4 sm:$0x11]  }
   0xd   :  { %319 = vmatpush3.bf16.xpose.msra.mxu0 %v130_v13  ;;  %349 = vmatpush3.bf16.xpose.msra.mxu1 %v130_v13  ;;  %v145_v46 = vsel %vm113_vm0, %v44_v43, 0 }
   0xe   :  { %360 = vmatprep.subr.msk.bf16.mxu0 %vm113_vm0, %v40_v14  ;;  %361 = vmatprep.subr.msk.bf16.mxu1 %vm113_vm0, %v40_v14  ;;  %v148_v48 = vsel %vm113_vm0, %v45_v47, 0 }
  0x10   :  { %230 = vperm.xlu0 %373, %v221_v20   ;;  %235 = vperm.xlu1 %374, %v222_v21  }
  0x14   :  { %82 = vperm.xlu0 %373, %v57_v24   ;;  %240 = vperm.xlu1 %374, %v223_v25  }
  0x15   :  { %321 = vmatpush3.bf16.xpose.msra.mxu0 %v133_v22  ;;  %350 = vmatpush3.bf16.xpose.msra.mxu1 %v133_v22 }
  0x16   :  { %362 = vmatprep.subr.msk.bf16.mxu0 %vm113_vm0, %v41_v23  ;;  %363 = vmatprep.subr.msk.bf16.mxu1 %vm113_vm0, %v41_v23 }
  0x18   :  { %87 = vperm.xlu0 %373, %v58_v28   ;;  %245 = vperm.xlu1 %374, %v224_v29  }
  0x1c   :  { %92 = vperm.xlu0 %373, %v59_v32   ;;  %250 = vperm.xlu1 %374, %v225_v33  }
  0x1d   :  { %323 = vmatpush3.bf16.xpose.msra.mxu0 %v136_v30  ;;  %351 = vmatpush3.bf16.xpose.msra.mxu1 %v136_v30 }
  0x1e   :  { %364 = vmatprep.subr.msk.bf16.mxu0 %vm113_vm0, %v42_v31  ;;  %365 = vmatprep.subr.msk.bf16.mxu1 %vm113_vm0, %v42_v31 }
  0x20   :  { %255 = vperm.xlu0 %373, %v226_v36   ;;  %260 = vperm.xlu1 %374, %v227_v37  }
  0x25   :  { %325 = vmatpush3.bf16.xpose.msra.mxu0 %v139_v38  ;;  %352 = vmatpush3.bf16.xpose.msra.mxu1 %v139_v38 }
  0x26   :  { %366 = vmatprep.subr.msk.bf16.mxu0 %vm113_vm0, %v43_v39  ;;  %367 = vmatprep.subr.msk.bf16.mxu1 %vm113_vm0, %v43_v39 }
  0x2d   :  { %327 = vmatpush3.bf16.xpose.msra.mxu0 %v142_v42  ;;  %353 = vmatpush3.bf16.xpose.msra.mxu1 %v142_v42  ;;  %v285_v42 = vstv %s552_s4 }
  0x2e   :  { %368 = vmatprep.subr.msk.bf16.mxu0 %vm113_vm0, %v44_v43  ;;  %369 = vmatprep.subr.msk.bf16.mxu1 %vm113_vm0, %v44_v43 }
  0x35   :  { %329 = vmatpush3.bf16.xpose.msra.mxu0 %v145_v46  ;;  %354 = vmatpush3.bf16.xpose.msra.mxu1 %v145_v46 }
  0x36   :  { %370 = vmatprep.subr.msk.bf16.mxu0 %vm113_vm0, %v45_v47  ;;  %371 = vmatprep.subr.msk.bf16.mxu1 %vm113_vm0, %v45_v47 }
  0x3d   :  { %331 = vmatpush3.bf16.xpose.msra.mxu0 %v148_v48  ;;  %355 = vmatpush3.bf16.xpose.msra.mxu1 %v148_v48 }
  0x44   :  { %333 = vmatmul.mubr.msk.bf16.vlgmr.msra.gmra.mrb[0].mxu0 %vm113_vm0, %v377_v49  ;;  %337 = vmatmul.mubr.msk.bf16.vlgmr.msra.gmra.mrb[0].mxu1 %vm113_vm0, %v378_v50 }
  0x87   :  { %v63_v51 = vpop.permute.xlu0 %62  ;;  %v73_v52 = vpop.permute.xlu1 %72 }
  0x8b   :  { %v68_v53 = vpop.permute.xlu0 %67  ;;  %v78_v54 = vpop.permute.xlu1 %77 }
  0x8f   :  { %v231_v55 = vpop.permute.xlu0 %230  ;;  %v236_v56 = vpop.permute.xlu1 %235 }
  0x93   :  { %v83_v57 = vpop.permute.xlu0 %82  ;;  %v241_v58 = vpop.permute.xlu1 %240 }
  0x97   :  { %v88_v59 = vpop.permute.xlu0 %87  ;;  %v246_v60 = vpop.permute.xlu1 %245 }
  0x9b   :  { %v93_v10 = vpop.permute.xlu0 %92  ;;  %v251_v15 = vpop.permute.xlu1 %250 }
  0x9f   :  { %v261_v27 = vpop.permute.xlu1 %260  ;;  %v256_v30 = vpop.permute.xlu0 %255 }
 0x117   :  { %v334_v61 = vpop.f32.mrb[0].mxu0  ;;  %v338_v62 = vpop.f32.mrb[0].mxu1 }
 0x118   :  { %v184_v63 = vpop.f32.mrb[1].mxu0  ;;  %v200_v0 = vpop.f32.mrb[1].mxu1  ;;  %v193_v1 = vadd.f32 %v334_v61, %v73_v52  ;;  %v209_v14 = vadd.f32 %v338_v62, %v93_v10 }
 0x119   :  { %v185_v2 = vadd.f32 %v184_v63, %v63_v51  ;;  %v335_v3 = vpop.f32.mrb[2].mxu0  ;;  %v339_v4 = vpop.f32.mrb[2].mxu1  ;;  %v201_v12 = vadd.f32 %v200_v0, %v83_v57 }
 0x11a   :  { %v187_v5 = vpop.f32.mrb[3].mxu0  ;;  %v203_v6 = vpop.f32.mrb[3].mxu1  ;;  %v196_v8 = vadd.f32 %v335_v3, %v78_v54  ;;  %v216_v11 = vmax.f32 %v193_v1, 0.0  ;;  %v220_v23 = vmax.f32 %v209_v14, 0.0 }
 0x11b   :  { %v214_v7 = vmax.f32 %v185_v2, 0.0  ;;  %v188_v9 = vadd.f32 %v187_v5, %v68_v53  ;;  %v204_v19 = vadd.f32 %v203_v6, %v88_v59  ;;  %v218_v21 = vmax.f32 %v201_v12, 0.0 }
 0x11c   :  { %v217_v17 = vmax.f32 %v196_v8, 0.0  ;;  %v265_v20 = vmul.f32 %v241_v58, %v216_v11  ;;  %v269_v31 = vmul.f32 %v261_v27, %v220_v23 }
 0x11d   :  { %v215_v13 = vmax.f32 %v188_v9, 0.0  ;;  %v263_v16 = vmul.f32 %v231_v55, %v214_v7  ;;  %v219_v26 = vmax.f32 %v204_v19, 0.0  ;;  %v267_v28 = vmul.f32 %v251_v15, %v218_v21 }
 0x11e   :  { %v266_v24 = vmul.f32 %v246_v60, %v217_v17  ;;  %v276_v35 = vsel %vm275_vm1, %v269_v31, 0.0 }
 0x11f   :  { %v264_v18 = vmul.f32 %v236_v56, %v215_v13  ;;  %v268_v32 = vmul.f32 %v256_v30, %v219_v26 }
 0x121   :  { %v270_v22 = vadd.f32 %v264_v18, %v263_v16 }
 0x123   :  { %v271_v25 = vadd.f32 %v270_v22, %v265_v20 }
 0x125   :  { %v272_v29 = vadd.f32 %v271_v25, %v266_v24 }
 0x127   :  { %v273_v33 = vadd.f32 %v272_v29, %v267_v28 }
 0x129   :  { %v274_v34 = vadd.f32 %v273_v33, %v268_v32 }
 0x12b   :  { %v277_v36 = vadd.f32 %v276_v35, %v274_v34 }
 0x12d   :  { %v278_v37 = vrot.slane %v277_v36, 4 }
 0x12f   :  { %v279_v38 = vadd.f32 %v278_v37, %v277_v36 }
 0x131   :  { %v280_v39 = vrot.slane %v279_v38, 2 }
 0x133   :  { %v281_v40 = vadd.f32 %v280_v39, %v279_v38 }
 0x135   :  { %v282_v41 = vrot.slane %v281_v40, 1 }
 0x137   :  { %v283_v43 = vadd.f32 %v282_v41, %v281_v40 }
 0x139   :  { %v286_v44 = vadd.f32 %v285_v42, %v283_v43 }
 0x13b   :  { %v287_v45 = vmul.f32 0.5, %v286_v44 }
 0x13d   :  { %379 = vtanh.f32 %v287_v45 }
 0x147   :  { %v380_v46 = vpop.eup %379 }
 0x148   :  { %v289_v47 = vadd.f32 1.0, %v380_v46 }
 0x14a   :  { %v290_v48 = vmul.f32 0.5, %v289_v47 }
 0x14c   :  { %291 = vst [vmem:[%s553_s5] sm:$0x1] %v290_v48 }

</bundles_post_ra>
